<compile_context>
chip_gen: v7x
topology: tpu7x:2x2x1
jax: 0.10.0
libtpu: 0.0.40
codegen_flags: <defaults>
</compile_context>

<pallas_src>
import jax
import jax.numpy as jnp
from jax import lax
from jax.experimental import pallas as pl
from jax.experimental.pallas import tpu as pltpu

INPUT_SIZE = 5
OUTPUT_SIZE = 2

# Max rows per batch tile.  Must be a multiple of 128 (lane-dense output tile).
_BATCH_TILE = 8192


def _linear_kernel(x_ref, w_ref, b_ref, o_ref):
    # x_ref: (tb, K)   VMEM   batch tile of the input
    # w_ref: (N, K)    VMEM   PyTorch-layout weight (whole, reused every step)
    # b_ref: (N, 1)    VMEM   bias as a column (broadcasts over the lane axis)
    # o_ref: (N, tb)   VMEM   lane-dense output tile (tb lanes, full-width stores)
    acc = lax.dot_general(
        w_ref[...], x_ref[...],
        dimension_numbers=(((1,), (1,)), ((), ())),   # contract over K -> (N, tb)
        preferred_element_type=jnp.float32,
    )
    o_ref[...] = (acc + b_ref[...]).astype(o_ref.dtype)


def _choose_tile(batch, max_tb=_BATCH_TILE):
    """Pick (tile_rows, num_tiles).

    * batch <= max_tb: a single full-array block (no pipelining overhead).
    * otherwise: an even number of 128-aligned, near-equal tiles so that the
      "parallel" grid axis splits evenly across v7x's two TensorCores.
    """
    if batch <= max_tb:
        return batch, 1
    pairs = pl.cdiv(batch, 2 * max_tb)
    nb = 2 * pairs
    tb = pl.cdiv(batch, nb)
    tb = ((tb + 127) // 128) * 128          # lane-dense output tile => 128-aligned
    return tb, pl.cdiv(batch, tb)


def linear_forward(x, weight, bias, max_batch_tile=_BATCH_TILE):
    """Equivalent of nn.Linear(input_size, output_size).forward(x).

    `weight` is PyTorch layout (out_dim, in_dim) and is used as-is.
    """
    B, K = x.shape
    N = weight.shape[0]
    b_col = bias.reshape(N, 1)
    tb, nb = _choose_tile(B, max_batch_tile)

    out_t = pl.pallas_call(
        _linear_kernel,
        out_shape=jax.ShapeDtypeStruct((N, B), x.dtype),
        grid_spec=pltpu.PrefetchScalarGridSpec(
            num_scalar_prefetch=0,
            grid=(nb,),
            in_specs=[
                pl.BlockSpec((tb, K), lambda i: (i, 0)),   # x: tiled over rows
                pl.BlockSpec((N, K), lambda i: (0, 0)),    # weight: whole, reused
                pl.BlockSpec((N, 1), lambda i: (0, 0)),    # bias: whole, reused
            ],
            out_specs=pl.BlockSpec((N, tb), lambda i: (0, i)),  # lane-dense tiles
        ),
        compiler_params=pltpu.CompilerParams(
            # "parallel": lets Mosaic shard the batch axis across v7x's 2 TCs.
            dimension_semantics=("parallel",),
            # Explicit scoped-VMEM headroom (v5e default is only 16 MiB).
            vmem_limit_bytes=32 * 1024 * 1024,
        ),
    )(x, weight, b_col)

    # Single cheap transpose of the tiny (N, B) slab back to PyTorch's (B, N).
    return out_t.T


class Model:
    """Mirror of the PyTorch Model: a single nn.Linear(input_size, output_size)."""

    def __init__(self, input_size, output_size, key):
        kw, kb = jax.random.split(key)
        # PyTorch Linear default init: U(-1/sqrt(fan_in), 1/sqrt(fan_in))
        bound = 1.0 / (input_size ** 0.5)
        self.weight = jax.random.uniform(
            kw, (output_size, input_size), jnp.float32, -bound, bound
        )
        self.bias = jax.random.uniform(
            kb, (output_size,), jnp.float32, -bound, bound
        )

    def forward(self, x):
        output = linear_forward(x, self.weight, self.bias)
        # Note: host-side print; would force a sync/retrace if wrapped in jit.
        print("  In Model: input size", x.shape, "output size", output.shape)
        return output


if __name__ == "__main__":
    key = jax.random.PRNGKey(0)
    k_x, k_m, k_big = jax.random.split(key, 3)

    # Small-batch path (matches the PyTorch DDP toy setup): single grid step.
    batch = 8
    x = jax.random.normal(k_x, (batch, INPUT_SIZE), jnp.float32)
    model = Model(INPUT_SIZE, OUTPUT_SIZE, k_m)
    out = jax.block_until_ready(model.forward(x))
    ref = x @ model.weight.T + model.bias
    assert out.shape == (batch, OUTPUT_SIZE)
    assert jnp.allclose(out, ref, atol=1e-5, rtol=1e-5)

    # Also exercise the multi-tile "parallel" path with a partial last block
    # (small max_batch_tile keeps the test data tiny: B=2500 -> 4 tiles of 640).
    big_batch = 2500
    x_big = jax.random.normal(k_big, (big_batch, INPUT_SIZE), jnp.float32)
    out_big = jax.block_until_ready(
        linear_forward(x_big, model.weight, model.bias, max_batch_tile=1024)
    )
    ref_big = x_big @ model.weight.T + model.bias
    assert out_big.shape == (big_batch, OUTPUT_SIZE)
    assert jnp.allclose(out_big, ref_big, atol=1e-5, rtol=1e-5)

    print("KERNEL_OK")
</pallas_src>

<mosaic_0001>
module attributes {stable_mosaic.version = 11 : i64} {
  func.func @_linear_kernel(%arg0: i32, %arg1: memref<8x5xf32, #tpu.memory_space<vmem>>, %arg2: memref<2x5xf32, #tpu.memory_space<vmem>>, %arg3: memref<2x1xf32, #tpu.memory_space<vmem>>, %arg4: memref<2x8xf32, #tpu.memory_space<vmem>>) attributes {dimension_semantics = [#tpu.dimension_semantics<parallel>], iteration_bounds = array<i64: 1>, scalar_prefetch = 0 : i64, scratch_operands = 0 : i64, tpu.core_type = #tpu.core_type<tc>, window_params = [{transform_indices = @transform_0, window_bounds = array<i64: 8, 5>}, {pipeline_mode = #tpu.pipeline_mode<synchronous>, transform_indices = @transform_1, window_bounds = array<i64: 2, 5>}, {pipeline_mode = #tpu.pipeline_mode<synchronous>, transform_indices = @transform_2, window_bounds = array<i64: 2, 1>}, {transform_indices = @transform_3, window_bounds = array<i64: 2, 8>}]} {
    %c0 = arith.constant 0 : index
    %c0_0 = arith.constant 0 : index
    %0 = vector.load %arg2[%c0, %c0_0] : memref<2x5xf32, #tpu.memory_space<vmem>>, vector<2x5xf32>
    %c0_1 = arith.constant 0 : index
    %c0_2 = arith.constant 0 : index
    %1 = vector.load %arg1[%c0_1, %c0_2] : memref<8x5xf32, #tpu.memory_space<vmem>>, vector<8x5xf32>
    %cst = arith.constant dense<0.000000e+00> : vector<2x8xf32>
    %2 = tpu.matmul %0, %1, %cst {dimension_numbers = #tpu.dot_dimension_numbers<[1], [1], [0], [0], [0, 0, 1, 0], [], []>} : vector<2x5xf32>, vector<8x5xf32>, vector<2x8xf32> -> vector<2x8xf32>
    %c0_3 = arith.constant 0 : index
    %c0_4 = arith.constant 0 : index
    %3 = vector.load %arg3[%c0_3, %c0_4] : memref<2x1xf32, #tpu.memory_space<vmem>>, vector<2x1xf32>
    %4 = vector.broadcast %3 : vector<2x1xf32> to vector<2x8xf32>
    %5 = arith.addf %2, %4 : vector<2x8xf32>
    %c0_5 = arith.constant 0 : index
    %c0_6 = arith.constant 0 : index
    %6 = vector.load %arg4[%c0_5, %c0_6] : memref<2x8xf32, #tpu.memory_space<vmem>>, vector<2x8xf32>
    tpu.vector_store %arg4[%c0_5, %c0_6], %5 {strides = array<i32>} : memref<2x8xf32, #tpu.memory_space<vmem>>, vector<2x8xf32>,
    return
  }
  func.func @transform_0(%arg0: i32) -> (i32, i32) {
    %c0_i32 = arith.constant 0 : i32
    %c0_i32_0 = arith.constant 0 : i32
    return %arg0, %c0_i32 : i32, i32
  }
  func.func @transform_1(%arg0: i32) -> (i32, i32) {
    %c0_i32 = arith.constant 0 : i32
    %c0_i32_0 = arith.constant 0 : i32
    %c0_i32_1 = arith.constant 0 : i32
    return %c0_i32, %c0_i32_0 : i32, i32
  }
  func.func @transform_2(%arg0: i32) -> (i32, i32) {
    %c0_i32 = arith.constant 0 : i32
    %c0_i32_0 = arith.constant 0 : i32
    %c0_i32_1 = arith.constant 0 : i32
    return %c0_i32, %c0_i32_0 : i32, i32
  }
  func.func @transform_3(%arg0: i32) -> (i32, i32) {
    %c0_i32 = arith.constant 0 : i32
    %c0_i32_0 = arith.constant 0 : i32
    return %c0_i32, %arg0 : i32, i32
  }
}

</mosaic_0001>

<bundles_post_ra>
// kernel: tpu_custom_call.1
= control target key start
LH: loop header
LB: loop body
LE: loop exit
PB: predicated region body
PF: predicated region fallthrough
CT: control target
= control target key end

     0   :  { %8 = vsyncpa [#allocation3], 0  ;;  %s247_s0 = inlined_call_operand.hbm [shape: f32[8,5], index: 0, kind: input, shape index: {}]   ;;  %s248_s1 = inlined_call_operand.vmem [shape: f32[2,5], index: 1, kind: input, shape index: {}]   ;;  %s249_s2 = inlined_call_operand.vmem [shape: f32[2,1], index: 2, kind: input, shape index: {}]   ;;  %s250_s3 = inlined_call_operand.hbm [shape: f32[2,8], index: 3, kind: output, shape index: {}]  }
   0x1   :  { %9 = vsyncpa [#allocation4], 0  ;;  %s192_s12 = smov [#allocation2]   ;;  %s144_s16 = scalar_lea.hbm %s247_s0, 128 }
   0x2   :  { %s16_s13 = sshll.u32 %s192_s12, 4  ;;  %p145_p0 = scmp.ne.s32.totalorder %s247_s0, %s144_s16  ;;  %s17_s13 = int_to_ptr.vmem [resolvable:$true] %s16_s13 }
   0x3   :  { %p148_p1 = scmp.lt.u32.totalorder %s144_s16, %s247_s0 }
   0x5   :  { %p150_p2 = pnand %p148_p1, %p145_p0 }
   0x7   :  { %153 = shalt.err (!%p150_p2)
}
   0x8   :  { %s154_s21 = scalar_lea.vmem %s17_s13, 128  ;;  %p159_p4 = scmp.lt.s32.totalorder %s17_s13, %s17_s13 }
   0x9   :  { %p155_p3 = scmp.ne.s32.totalorder %s17_s13, %s154_s21  ;;  %p160_p5 = scmp.lt.s32.totalorder %s154_s21, %s154_s21 }
   0xb   :  { %p161_p6 = por %p160_p5, %p159_p4 }
   0xd   :  { %p162_p7 = pnand %p161_p6, %p155_p3 }
   0xf   :  { %165 = shalt.err (!%p162_p7)
}
  0x10   :  { %19 = dma.hbm_to_vmem [thread:$0]  %s247_s0, 128, %s17_s13, [#allocation3]  }
  0x11   :  { %188 = dma.done.wait [#allocation3], 128  }
  0x12   :  { %189 = vsyncadd [#allocation3], 4294967168  ;;  %v193_v0 = vmov 0.0   ;;  %vm194_vm0 = vmmov 0   ;;  %v195_v1 = vmov 0   ;;  %vm35_vm1 = vcmask 39936  }
  0x13   :  { %133 = vmatprep.subr.mxu0 %v193_v0  ;;  %135 = vmatprep.mubr.msk.f32.mxu0 %vm194_vm0, %v193_v0  ;;  %v28_v2 = vld [vmem:[#allocation2] sm:$0xff]  ;;  %s196_s0 = smov [#allocation5]   ;;  %vm112_vm2 = vcmask 58368  }
  0x14   :  { %143 = vset.pattern.permute.xlu0 %v195_v1  ;;  %v29_v3 = vld [vmem:[%s249_s2] sm:$0x3]  ;;  %134 = vmatpush3.xpose.msk.msra.mxu0 %vm35_vm1, %v28_v2  ;;  %s120_s28 = sshll.u32 %s196_s0, 4  ;;  %s121_s28 = int_to_ptr.vmem [resolvable:$true] %s120_s28 }
  0x15   :  { %v27_v4 = vld [vmem:[%s248_s1] sm:$0x3]  ;;  %32 = vperm.xlu0 %143, %v29_v3   ;;  %s166_s29 = scalar_lea.vmem %s121_s28, 32  ;;  %p171_p9 = scmp.lt.s32.totalorder %s121_s28, %s121_s28 }
  0x16   :  { %p167_p8 = scmp.ne.s32.totalorder %s121_s28, %s166_s29  ;;  %p172_p10 = scmp.lt.s32.totalorder %s166_s29, %s166_s29 }
  0x17   :  { %136 = vmatmul.mubr.msk.f32.vlgmr.msra.gmra.mrb[0].mxu0 %vm35_vm1, %v27_v4 }
  0x18   :  { %p173_p11 = por %p172_p10, %p171_p9 }
  0x1a   :  { %p174_p12 = pnand %p173_p11, %p167_p8 }
  0x94   :  { %v33_v5 = vpop.permute.xlu0 %32 }
  0xea   :  { %v108_v6 = vpop.f32.mrb[0].mxu0 }
  0xeb   :  { %v109_v7 = vadd.f32 %v108_v6, %v33_v5  ;;  %v137_v8 = vpop.f32.mrb[1].mxu0 }
  0xed   :  { %113 = vst.msk [vmem:[#allocation5] sm:$0x3] %vm112_vm2, %v109_v7 }
  0xee   :  { %177 = shalt.err (!%p174_p12)
}
  0xef   :  { %s178_s30 = scalar_lea.hbm %s250_s3, 32 }
  0xf0   :  { %p179_p13 = scmp.ne.s32.totalorder %s250_s3, %s178_s30  ;;  %p182_p0 = scmp.lt.u32.totalorder %s178_s30, %s250_s3 }
  0xf2   :  { %p184_p1 = pnand %p182_p0, %p179_p13 }
  0xf4   :  { %187 = shalt.err (!%p184_p1)
}
  0xf5   :  { %123 = dma.vmem_to_hbm [thread:$0]  %s121_s28, 32, %s250_s3, [#allocation4]  }
  0xf6   :  { %190 = dma.done.wait [#allocation4], 32  }
  0xf7   :  { %191 = vsyncadd [#allocation4], 4294967264 }
  0xf8   :  { %127 = vsyncpa [#allocation3], 1 }
  0xf9   :  { %128 = vsyncpa [#allocation4], 1 }

</bundles_post_ra>
